<compile_context>
chip_gen: v7x
topology: tpu7x:2x2x1
jax: 0.10.0
libtpu: 0.0.40
codegen_flags: <defaults>
</compile_context>

<pallas_src>
import functools

import jax
import jax.numpy as jnp
from jax.experimental import pallas as pl
from jax.experimental.pallas import tpu as pltpu


def _fused_kernel(n_cols, sum_ni, widths, x_ref, table_ref, *rest):
    """Fused forward for one batch tile.

    refs:
      x_ref      int32 (TB, n_cols)   categorical indices, pre-offset per column
      table_ref  bf16  (sum_ni, sum_nf) block-diagonal packed embedding tables
      rest[:-2]  bf16  weight refs: w_0 .. w_{L-1}, w_out   (in, out) each
      rest[-2]   f32   (L+1, max_width) packed biases (BN already folded in)
      rest[-1]   f32   (TB, out_size)  output
    """
    o_ref = rest[-1]
    bpack_ref = rest[-2]
    w_refs = rest[:-2]
    tb = x_ref.shape[0]

    # --- single multi-hot over the stacked vocab (one 1 per column region) ---
    iota = jax.lax.broadcasted_iota(jnp.int32, (tb, sum_ni), 1)
    hot = None
    for c in range(n_cols):
        m = iota == x_ref[:, c : c + 1]
        hot = m if hot is None else jnp.logical_or(hot, m)
    hot = hot.astype(jnp.float32)

    # --- one fused embedding "gather" matmul (bf16 operands, f32 accumulate) ---
    x = jnp.dot(hot.astype(jnp.bfloat16), table_ref[...],
                preferred_element_type=jnp.float32)
    # embedding dropout: eval-mode identity

    # --- hidden layers: Linear (+ folded BN from previous layer) -> ReLU ---
    n_hidden = len(w_refs) - 1
    for j in range(n_hidden):
        h = widths[j]
        b = bpack_ref[j : j + 1, :h]                       # (1, h) f32
        x = jnp.dot(x.astype(jnp.bfloat16), w_refs[j][...],
                    preferred_element_type=jnp.float32) + b
        x = jnp.maximum(x, 0.0)

    # --- final Linear (absorbs last hidden layer's BN scale/shift) ---
    h = widths[-1]
    b = bpack_ref[n_hidden : n_hidden + 1, :h]
    o_ref[...] = jnp.dot(x.astype(jnp.bfloat16), w_refs[-1][...],
                         preferred_element_type=jnp.float32) + b


def init_params(key, embedding_size, layers, output_size, bn_eps=1e-5):
    """Deterministic synthetic parameters matching the torch module's shapes.
    Linear weights are stored pre-transposed as (in, out).  BatchNorm1d running
    stats/affine are pre-folded into per-feature (scale, shift)."""
    params = {"emb": [], "hidden": []}

    for (ni, nf) in embedding_size:
        key, k = jax.random.split(key)
        params["emb"].append(jax.random.normal(k, (ni, nf), jnp.float32) * 0.1)

    input_size = sum(nf for _, nf in embedding_size)
    for h in layers:
        key, kw, kb, kg, kbeta, km, kv = jax.random.split(key, 7)
        w = jax.random.normal(kw, (input_size, h), jnp.float32) * (1.0 / jnp.sqrt(input_size))
        b = jax.random.normal(kb, (1, h), jnp.float32) * 0.01
        gamma = 1.0 + 0.1 * jax.random.normal(kg, (1, h), jnp.float32)
        beta = 0.1 * jax.random.normal(kbeta, (1, h), jnp.float32)
        run_mean = 0.05 * jax.random.normal(km, (1, h), jnp.float32)
        run_var = 1.0 + 0.1 * jax.random.uniform(kv, (1, h), jnp.float32)
        scale = gamma / jnp.sqrt(run_var + bn_eps)
        shift = beta - run_mean * scale
        params["hidden"].append({"w": w, "b": b, "scale": scale, "shift": shift})
        input_size = h

    key, kw, kb = jax.random.split(key, 3)
    params["w_out"] = jax.random.normal(kw, (input_size, output_size), jnp.float32) * (
        1.0 / jnp.sqrt(input_size)
    )
    params["b_out"] = jax.random.normal(kb, (1, output_size), jnp.float32) * 0.01
    return params


def fuse_params(params, embedding_size, layers, output_size):
    """Plain-JAX glue: pack tables block-diagonally, fold BN scale/shift into
    the next layer's weights/bias, pack all biases into one small array."""
    sum_ni = sum(ni for ni, _ in embedding_size)
    sum_nf = sum(nf for _, nf in embedding_size)

    table = jnp.zeros((sum_ni, sum_nf), jnp.float32)
    row_off = []
    r = c = 0
    for tbl in params["emb"]:
        ni, nf = tbl.shape
        table = table.at[r : r + ni, c : c + nf].set(tbl)
        row_off.append(r)
        r += ni
        c += nf
    row_off = jnp.asarray(row_off, jnp.int32)

    # Fold layer-j BN (y = relu_out*scale_j + shift_j) into layer j+1:
    #   w_{j+1}' = diag(scale_j) @ w_{j+1} ; b_{j+1}' = b_{j+1} + shift_j @ w_{j+1}
    ws, bs = [], []
    prev_scale = prev_shift = None
    for layer in params["hidden"]:
        w, b = layer["w"], layer["b"]
        if prev_scale is not None:
            b = b + prev_shift @ w
            w = prev_scale.reshape(-1, 1) * w
        ws.append(w)
        bs.append(b)
        prev_scale, prev_shift = layer["scale"], layer["shift"]

    w_out, b_out = params["w_out"], params["b_out"]
    if prev_scale is not None:
        b_out = b_out + prev_shift @ w_out
        w_out = prev_scale.reshape(-1, 1) * w_out
    ws.append(w_out)
    bs.append(b_out)

    widths = tuple(layers) + (output_size,)
    max_w = max(widths)
    b_pack = jnp.zeros((len(bs), max_w), jnp.float32)
    for j, b in enumerate(bs):
        b_pack = b_pack.at[j, : b.shape[1]].set(b[0])

    return {
        "table": table.astype(jnp.bfloat16),      # exact 0/1 one-hot x bf16 weights
        "row_off": row_off,
        "ws": [w.astype(jnp.bfloat16) for w in ws],
        "b_pack": b_pack,
        "widths": widths,
        "sum_ni": sum_ni,
    }


def model_forward(x_cat, fused, *, max_batch_tile=512):
    """Batch-tiled fused forward.  Weights/table/biases stay VMEM-resident via
    constant index_maps; batch axis is 'parallel' (megacore on v7x)."""
    B, n_cols = x_cat.shape
    sum_ni = fused["sum_ni"]
    widths = fused["widths"]
    out_size = widths[-1]

    # pre-offset indices into the stacked-table row space (plain-JAX glue)
    x_off = (x_cat + fused["row_off"][None, :]).astype(jnp.int32)

    # batch tile: whole batch if small, otherwise a multiple-of-8 cap sized
    # conservatively for v7x's 64 MiB VMEM (one-hot/activations are 128-lane padded)
    tb = B if B <= max_batch_tile else max_batch_tile
    grid = (pl.cdiv(B, tb),)

    kernel = functools.partial(_fused_kernel, n_cols, sum_ni, widths)

    args = [x_off, fused["table"], *fused["ws"], fused["b_pack"]]
    in_specs = (
        [pl.BlockSpec((tb, n_cols), lambda i: (i, 0))]
        + [pl.BlockSpec(fused["table"].shape, lambda i: (0, 0))]
        + [pl.BlockSpec(w.shape, lambda i: (0, 0)) for w in fused["ws"]]
        + [pl.BlockSpec(fused["b_pack"].shape, lambda i: (0, 0))]
    )
    out_specs = pl.BlockSpec((tb, out_size), lambda i: (i, 0))

    return pl.pallas_call(
        kernel,
        out_shape=jax.ShapeDtypeStruct((B, out_size), jnp.float32),
        grid=grid,
        in_specs=in_specs,
        out_specs=out_specs,
        compiler_params=pltpu.CompilerParams(dimension_semantics=("parallel",)),
    )(*args)


if __name__ == "__main__":
    # small shapes consistent with the module
    embedding_size = [(10, 4), (8, 4), (6, 8)]  # (num_categories, emb_dim) per column
    layers = [32, 16]
    output_size = 2
    batch = 8

    root = jax.random.PRNGKey(0)
    k_params, k_data = jax.random.split(root)

    params = init_params(k_params, embedding_size, layers, output_size)
    fused = fuse_params(params, embedding_size, layers, output_size)

    # categorical inputs: one index per column, within each column's vocab
    cols = []
    for i, (ni, _) in enumerate(embedding_size):
        k_data, k = jax.random.split(k_data)
        cols.append(jax.random.randint(k, (batch, 1), 0, ni, dtype=jnp.int32))
    x_cat = jnp.concatenate(cols, axis=1)  # (batch, n_cols) int32

    # TODO(synk): training-mode Dropout / BatchNorm batch-stat updates are not
    # implemented (eval-mode forward only, matching module.eval()).
    out = model_forward(x_cat, fused)
    out = jax.block_until_ready(out)

    assert out.shape == (batch, output_size)
    assert bool(jnp.all(jnp.isfinite(out)))
    print("KERNEL_OK")
</pallas_src>

<mosaic_0001>
module attributes {stable_mosaic.version = 11 : i64} {
  func.func @_fused_kernel(%arg0: i32, %arg1: memref<8x3xi32, #tpu.memory_space<vmem>>, %arg2: memref<24x16xbf16, #tpu.memory_space<vmem>>, %arg3: memref<16x32xbf16, #tpu.memory_space<vmem>>, %arg4: memref<32x16xbf16, #tpu.memory_space<vmem>>, %arg5: memref<16x2xbf16, #tpu.memory_space<vmem>>, %arg6: memref<3x32xf32, #tpu.memory_space<vmem>>, %arg7: memref<8x2xf32, #tpu.memory_space<vmem>>) attributes {dimension_semantics = [#tpu.dimension_semantics<parallel>], iteration_bounds = array<i64: 1>, scalar_prefetch = 0 : i64, scratch_operands = 0 : i64, tpu.core_type = #tpu.core_type<tc>, window_params = [{transform_indices = @transform_0, window_bounds = array<i64: 8, 3>}, {pipeline_mode = #tpu.pipeline_mode<synchronous>, transform_indices = @transform_1, window_bounds = array<i64: 24, 16>}, {pipeline_mode = #tpu.pipeline_mode<synchronous>, transform_indices = @transform_2, window_bounds = array<i64: 16, 32>}, {pipeline_mode = #tpu.pipeline_mode<synchronous>, transform_indices = @transform_3, window_bounds = array<i64: 32, 16>}, {pipeline_mode = #tpu.pipeline_mode<synchronous>, transform_indices = @transform_4, window_bounds = array<i64: 16, 2>}, {pipeline_mode = #tpu.pipeline_mode<synchronous>, transform_indices = @transform_5, window_bounds = array<i64: 3, 32>}, {transform_indices = @transform_6, window_bounds = array<i64: 8, 2>}]} {
    %0 = tpu.iota {dimensions = array<i32: 1>} : vector<8x24xi32>
    %c0 = arith.constant 0 : index
    %c0_0 = arith.constant 0 : index
    %1 = vector.load %arg1[%c0, %c0_0] : memref<8x3xi32, #tpu.memory_space<vmem>>, vector<8x1xi32>
    %2 = vector.broadcast %1 : vector<8x1xi32> to vector<8x24xi32>
    %3 = arith.cmpi eq, %0, %2 : vector<8x24xi32>
    %c0_1 = arith.constant 0 : index
    %c1 = arith.constant 1 : index
    %4 = vector.load %arg1[%c0_1, %c1] : memref<8x3xi32, #tpu.memory_space<vmem>>, vector<8x1xi32>
    %5 = vector.broadcast %4 : vector<8x1xi32> to vector<8x24xi32>
    %6 = arith.cmpi eq, %0, %5 : vector<8x24xi32>
    %7 = arith.ori %3, %6 : vector<8x24xi1>
    %c0_2 = arith.constant 0 : index
    %c2 = arith.constant 2 : index
    %8 = vector.load %arg1[%c0_2, %c2] : memref<8x3xi32, #tpu.memory_space<vmem>>, vector<8x1xi32>
    %9 = vector.broadcast %8 : vector<8x1xi32> to vector<8x24xi32>
    %10 = arith.cmpi eq, %0, %9 : vector<8x24xi32>
    %11 = arith.ori %7, %10 : vector<8x24xi1>
    %12 = arith.extui %11 : vector<8x24xi1> to vector<8x24xi32>
    %13 = arith.sitofp %12 : vector<8x24xi32> to vector<8x24xf32>
    %14 = arith.truncf %13 : vector<8x24xf32> to vector<8x24xbf16>
    %c0_3 = arith.constant 0 : index
    %c0_4 = arith.constant 0 : index
    %15 = vector.load %arg2[%c0_3, %c0_4] : memref<24x16xbf16, #tpu.memory_space<vmem>>, vector<24x16xbf16>
    %cst = arith.constant dense<0.000000e+00> : vector<8x16xf32>
    %16 = tpu.matmul %14, %15, %cst {dimension_numbers = #tpu.dot_dimension_numbers<[1], [0], [0], [1], [0, 0, 1, 1], [], []>} : vector<8x24xbf16>, vector<24x16xbf16>, vector<8x16xf32> -> vector<8x16xf32>
    %c0_5 = arith.constant 0 : index
    %c0_6 = arith.constant 0 : index
    %17 = vector.load %arg6[%c0_5, %c0_6] : memref<3x32xf32, #tpu.memory_space<vmem>>, vector<1x32xf32>
    %18 = arith.truncf %16 : vector<8x16xf32> to vector<8x16xbf16>
    %c0_7 = arith.constant 0 : index
    %c0_8 = arith.constant 0 : index
    %19 = vector.load %arg3[%c0_7, %c0_8] : memref<16x32xbf16, #tpu.memory_space<vmem>>, vector<16x32xbf16>
    %cst_9 = arith.constant dense<0.000000e+00> : vector<8x32xf32>
    %20 = tpu.matmul %18, %19, %cst_9 {dimension_numbers = #tpu.dot_dimension_numbers<[1], [0], [0], [1], [0, 0, 1, 1], [], []>} : vector<8x16xbf16>, vector<16x32xbf16>, vector<8x32xf32> -> vector<8x32xf32>
    %21 = vector.broadcast %17 : vector<1x32xf32> to vector<8x32xf32>
    %22 = arith.addf %20, %21 : vector<8x32xf32>
    %cst_10 = arith.constant 0.000000e+00 : f32
    %23 = vector.broadcast %cst_10 : f32 to vector<8x32xf32>
    %24 = arith.maximumf %22, %23 : vector<8x32xf32>
    %c1_11 = arith.constant 1 : index
    %c0_12 = arith.constant 0 : index
    %25 = vector.load %arg6[%c1_11, %c0_12] : memref<3x32xf32, #tpu.memory_space<vmem>>, vector<1x16xf32>
    %26 = arith.truncf %24 : vector<8x32xf32> to vector<8x32xbf16>
    %c0_13 = arith.constant 0 : index
    %c0_14 = arith.constant 0 : index
    %27 = vector.load %arg4[%c0_13, %c0_14] : memref<32x16xbf16, #tpu.memory_space<vmem>>, vector<32x16xbf16>
    %cst_15 = arith.constant dense<0.000000e+00> : vector<8x16xf32>
    %28 = tpu.matmul %26, %27, %cst_15 {dimension_numbers = #tpu.dot_dimension_numbers<[1], [0], [0], [1], [0, 0, 1, 1], [], []>} : vector<8x32xbf16>, vector<32x16xbf16>, vector<8x16xf32> -> vector<8x16xf32>
    %29 = vector.broadcast %25 : vector<1x16xf32> to vector<8x16xf32>
    %30 = arith.addf %28, %29 : vector<8x16xf32>
    %cst_16 = arith.constant 0.000000e+00 : f32
    %31 = vector.broadcast %cst_16 : f32 to vector<8x16xf32>
    %32 = arith.maximumf %30, %31 : vector<8x16xf32>
    %c2_17 = arith.constant 2 : index
    %c0_18 = arith.constant 0 : index
    %33 = vector.load %arg6[%c2_17, %c0_18] : memref<3x32xf32, #tpu.memory_space<vmem>>, vector<1x2xf32>
    %34 = arith.truncf %32 : vector<8x16xf32> to vector<8x16xbf16>
    %c0_19 = arith.constant 0 : index
    %c0_20 = arith.constant 0 : index
    %35 = vector.load %arg5[%c0_19, %c0_20] : memref<16x2xbf16, #tpu.memory_space<vmem>>, vector<16x2xbf16>
    %cst_21 = arith.constant dense<0.000000e+00> : vector<8x2xf32>
    %36 = tpu.matmul %34, %35, %cst_21 {dimension_numbers = #tpu.dot_dimension_numbers<[1], [0], [0], [1], [0, 0, 1, 1], [], []>} : vector<8x16xbf16>, vector<16x2xbf16>, vector<8x2xf32> -> vector<8x2xf32>
    %37 = vector.broadcast %33 : vector<1x2xf32> to vector<8x2xf32>
    %38 = arith.addf %36, %37 : vector<8x2xf32>
    %c0_22 = arith.constant 0 : index
    %c0_23 = arith.constant 0 : index
    %39 = vector.load %arg7[%c0_22, %c0_23] : memref<8x2xf32, #tpu.memory_space<vmem>>, vector<8x2xf32>
    tpu.vector_store %arg7[%c0_22, %c0_23], %38 {strides = array<i32>} : memref<8x2xf32, #tpu.memory_space<vmem>>, vector<8x2xf32>,
    return
  }
  func.func @transform_0(%arg0: i32) -> (i32, i32) {
    %c0_i32 = arith.constant 0 : i32
    %c0_i32_0 = arith.constant 0 : i32
    return %arg0, %c0_i32 : i32, i32
  }
  func.func @transform_1(%arg0: i32) -> (i32, i32) {
    %c0_i32 = arith.constant 0 : i32
    %c0_i32_0 = arith.constant 0 : i32
    %c0_i32_1 = arith.constant 0 : i32
    return %c0_i32, %c0_i32_0 : i32, i32
  }
  func.func @transform_2(%arg0: i32) -> (i32, i32) {
    %c0_i32 = arith.constant 0 : i32
    %c0_i32_0 = arith.constant 0 : i32
    %c0_i32_1 = arith.constant 0 : i32
    return %c0_i32, %c0_i32_0 : i32, i32
  }
  func.func @transform_3(%arg0: i32) -> (i32, i32) {
    %c0_i32 = arith.constant 0 : i32
    %c0_i32_0 = arith.constant 0 : i32
    %c0_i32_1 = arith.constant 0 : i32
    return %c0_i32, %c0_i32_0 : i32, i32
  }
  func.func @transform_4(%arg0: i32) -> (i32, i32) {
    %c0_i32 = arith.constant 0 : i32
    %c0_i32_0 = arith.constant 0 : i32
    %c0_i32_1 = arith.constant 0 : i32
    return %c0_i32, %c0_i32_0 : i32, i32
  }
  func.func @transform_5(%arg0: i32) -> (i32, i32) {
    %c0_i32 = arith.constant 0 : i32
    %c0_i32_0 = arith.constant 0 : i32
    %c0_i32_1 = arith.constant 0 : i32
    return %c0_i32, %c0_i32_0 : i32, i32
  }
  func.func @transform_6(%arg0: i32) -> (i32, i32) {
    %c0_i32 = arith.constant 0 : i32
    %c0_i32_0 = arith.constant 0 : i32
    return %arg0, %c0_i32 : i32, i32
  }
}

</mosaic_0001>

<bundles_post_ra>
// kernel: tpu_custom_call.1
= control target key start
LH: loop header
LB: loop body
LE: loop exit
PB: predicated region body
PF: predicated region fallthrough
CT: control target
= control target key end

     0   :  { %v360_v0 = vmov 0   ;;  %v361_v2 = vmov 2   ;;  %v362_v3 = vmov 0.0   ;;  %v363_v5 = vmov 1   ;;  %s439_s0 = inlined_call_operand.vmem [shape: s32[8,3], index: 0, kind: input, shape index: {}]   ;;  %s440_s1 = inlined_call_operand.vmem [shape: bf16[24,16], index: 1, kind: input, shape index: {}]   ;;  %s441_s2 = inlined_call_operand.vmem [shape: bf16[16,32], index: 2, kind: input, shape index: {}]   ;;  %s442_s3 = inlined_call_operand.vmem [shape: bf16[32,16], index: 3, kind: input, shape index: {}]   ;;  %s443_s4 = inlined_call_operand.vmem [shape: bf16[16,2], index: 4, kind: input, shape index: {}]   ;;  %s444_s5 = inlined_call_operand.vmem [shape: f32[3,32], index: 5, kind: input, shape index: {}]   ;;  %s445_s6 = inlined_call_operand.vmem [shape: f32[8,2], index: 6, kind: output, shape index: {}]  }
   0x1   :  { %350 = vset.pattern.permute.xlu0 %v360_v0  ;;  %v26_v1 = vld [vmem:[%s439_s0] sm:$0xff]  ;;  %352 = vset.pattern.permute.xlu1 %v361_v2  ;;  %v355_v6 = vld [vmem:[%s440_s1 + $0x8] ss:$0 sps:$4 sm:$0xff]   ;;  %vm60_vm0 = vcmask 1043456   ;;  %vm364_vm1 = vmmov 0   ;;  %v24_v8 = vlaneseq  ;;  %vm56_vm7 = vcmask 195584  }
   0x2   :  { %28 = vperm.xlu0 %350, %v26_v1   ;;  %37 = vperm.xlu1 %352, %v26_v1   ;;  %v354_v4 = vld [vmem:[%s440_s1] sm:$0xff]   ;;  %v62_v7 = vsel %vm60_vm0, %v355_v6, 0  ;;  %vm118_vm8 = vcmask 130048   ;;  %v358_v22 = vld [vmem:[%s442_s3 + $0x8] sm:$0xff]   ;;  %vm185_vm9 = vcmask 261120   ;;  %vm287_vm10 = vcmask 15360  }
   0x3   :  { %317 = vmatprep.subr.bf16.mxu0 %v362_v3  ;;  %325 = vmatprep.subr.bf16.mxu1 %v362_v3  ;;  %v25_v10 = vand.u32 127, %v24_v8  ;;  %v356_v15 = vld [vmem:[%s441_s2] sm:$0xff]  }
   0x4   :  { %318 = vmatpush3.bf16.msra.mxu0 %v354_v4  ;;  %321 = vmatprep.mubr.msk.bf16.mxu0 %vm364_vm1, %v362_v3  ;;  %v357_v17 = vld [vmem:[%s442_s3] sm:$0xff]  }
   0x5   :  { %319 = vmatprep.subr.bf16.mxu0 %v362_v3  ;;  %327 = vmatprep.mubr.msk.bf16.mxu1 %vm364_vm1, %v362_v3  ;;  %v359_v23 = vld [vmem:[%s443_s4] sm:$0xff]  }
   0x6   :  { %351 = vset.pattern.permute.xlu0 %v363_v5  ;;  %326 = vmatpush3.bf16.msra.mxu1 %v356_v15  ;;  %v297_v24 = vld [vmem:[%s444_s5] ss:$0 sm:$0xff]  ;;  %v300_v32 = vld [vmem:[%s444_s5 + $0x1] ss:$0 sm:$0xff]  ;;  %v304_v40 = vld [vmem:[%s444_s5 + $0x2] ss:$0 sm:$0xff] }
   0x7   :  { %32 = vperm.xlu0 %351, %v26_v1   ;;  %331 = vmatprep.subr.bf16.mxu1 %v362_v3 }
   0x8   :  { %320 = vmatpush3.bf16.msra.mxu0 %v62_v7 }
   0x9   :  { %339 = vmatprep.subr.bf16.mxu0 %v362_v3 }
   0xb   :  { %353 = vset.pattern.permute.xlu0 %v361_v2 }
  0x81   :  { %v29_v9 = vpop.permute.xlu0 %28  ;;  %v38_v11 = vpop.permute.xlu1 %37 }
  0x82   :  { %vm39_vm2 = vcmp.eq.s32.totalorder %v25_v10, %v38_v11  ;;  %vm30_vm3 = vcmp.eq.s32.totalorder %v25_v10, %v29_v9 }
  0x86   :  { %v33_v12 = vpop.permute.xlu0 %32 }
  0x87   :  { %vm34_vm4 = vcmp.eq.s32.totalorder %v25_v10, %v33_v12 }
  0x88   :  { %vm35_vm5 = vmor %vm30_vm3, %vm34_vm4 }
  0x89   :  { %vm40_vm6 = vmor %vm35_vm5, %vm39_vm2 }
  0x8a   :  { %v293_v13 = vsel %vm40_vm6, 1.0, %v362_v3 }
  0x8b   :  { %v43_v14 = vpack.c.bf16 %v293_v13, %v293_v13 }
  0x8d   :  { %322 = vmatmul.mubr.msk.bf16.vlgmr.msra.gmra.mrb[0].mxu0 %vm56_vm7, %v43_v14 }
  0x8e   :  { %341 = vmatprep.mubr.msk.bf16.mxu0 %vm364_vm1, %v362_v3  ;;  %340 = vmatpush3.bf16.msra.mxu0 %v359_v23 }
 0x160   :  { %v98_v16 = vpop.f32.mrb[0].mxu0 }
 0x161   :  { %v105_v18 = vpack.c.bf16 %v98_v16, %v98_v16  ;;  %v323_v19 = vpop.f32.mrb[1].mxu0 }
 0x162   :  { %v101_v20 = vpop.f32.mrb[2].mxu0 }
 0x163   :  { %v324_v21 = vpop.f32.mrb[3].mxu0  ;;  %328 = vmatmul.mubr.msk.bf16.vlgmr.msra.gmra.mrb[0].mxu1 %vm118_vm8, %v105_v18 }
 0x164   :  { %332 = vmatpush3.bf16.msra.mxu1 %v357_v17  ;;  %335 = vmatprep.mubr.msk.bf16.mxu1 %vm364_vm1, %v362_v3 }
 0x165   :  { %333 = vmatprep.subr.bf16.mxu1 %v362_v3 }
 0x168   :  { %334 = vmatpush3.bf16.msra.mxu1 %v358_v22 }
 0x236   :  { %v156_v25 = vpop.f32.mrb[0].mxu1 }
 0x237   :  { %v157_v26 = vadd.f32 %v297_v24, %v156_v25  ;;  %v329_v27 = vpop.f32.mrb[1].mxu1 }
 0x238   :  { %v159_v28 = vpop.f32.mrb[2].mxu1 }
 0x239   :  { %v162_v29 = vmax.f32 %v157_v26, 0.0  ;;  %v330_v30 = vpop.f32.mrb[3].mxu1 }
 0x23b   :  { %v164_v31 = vpack.c.bf16 %v162_v29, %v162_v29 }
 0x23d   :  { %336 = vmatmul.mubr.msk.bf16.vlgmr.msra.gmra.mrb[4].mxu1 %vm185_vm9, %v164_v31 }
 0x310   :  { %v223_v33 = vpop.f32.mrb[4].mxu1 }
 0x311   :  { %v224_v34 = vadd.f32 %v300_v32, %v223_v33  ;;  %v337_v35 = vpop.f32.mrb[5].mxu1 }
 0x312   :  { %v226_v36 = vpop.f32.mrb[6].mxu1 }
 0x313   :  { %v229_v37 = vmax.f32 %v224_v34, 0.0  ;;  %v338_v38 = vpop.f32.mrb[7].mxu1 }
 0x315   :  { %v231_v39 = vpack.c.bf16 %v229_v37, %v229_v37 }
 0x317   :  { %342 = vmatmul.mubr.msk.bf16.vlgmr.msra.gmra.mrb[4].mxu0 %vm118_vm8, %v231_v39 }
 0x3ea   :  { %v281_v41 = vpop.f32.mrb[4].mxu0 }
 0x3eb   :  { %v282_v42 = vadd.f32 %v304_v40, %v281_v41  ;;  %v343_v43 = vpop.f32.mrb[5].mxu0 }
 0x3ec   :  { %v284_v44 = vpop.f32.mrb[6].mxu0 }
 0x3ed   :  { %288 = vst.msk [vmem:[%s445_s6] sm:$0xff] %vm287_vm10, %v282_v42  ;;  %v344_v45 = vpop.f32.mrb[7].mxu0 }

</bundles_post_ra>
